<compile_context>
chip_gen: v5e
topology: v5e:2x2
jax: 0.10.0
libtpu: 0.0.40
codegen_flags: <defaults>
</compile_context>

<pallas_src>
import jax
import jax.numpy as jnp
from jax.experimental import pallas as pl
from jax.experimental.pallas import tpu as pltpu


def _scalar_kernel(const_ref, out_ref):
    # SMEM -> SMEM 1-D scalar copy; stays entirely on the scalar path.
    out_ref[0] = const_ref[0]


def scalar_forward_kernel(constant_1d: jax.Array) -> jax.Array:
    """Standalone identity kernel for a (1,) float32 scalar parameter.

    Only for the case where a kernel boundary is mandated.  The input buffer
    is NOT donated, so a persistent parameter can be passed every step.
    """
    return pl.pallas_call(
        _scalar_kernel,
        out_shape=jax.ShapeDtypeStruct((1,), jnp.float32),
        in_specs=[pl.BlockSpec(memory_space=pltpu.SMEM)],
        out_specs=pl.BlockSpec(memory_space=pltpu.SMEM),
        cost_estimate=pl.CostEstimate(
            flops=0, transcendentals=0, bytes_accessed=8
        ),
    )(constant_1d)


class ScalarPallas:
    """JAX/Pallas analogue of the PyTorch `Scalar` module."""

    def __init__(self, init_value: float):
        # nn.Parameter(torch.tensor(init_value, dtype=torch.float32)) -> 0-d f32.
        self.constant = jnp.asarray(init_value, dtype=jnp.float32)

    def __call__(self) -> jax.Array:
        # forward() is a pure identity; returning the parameter directly is
        # the zero-overhead, fully fusible path (per performance review).
        return self.constant


if __name__ == "__main__":
    # Deterministic "input": the module takes no forward inputs; its only
    # state is init_value, derived from PRNGKey(0).
    key = jax.random.PRNGKey(0)
    init_value = float(jax.random.uniform(key, (), dtype=jnp.float32))

    # Primary (kernel-free) forward path — matches PyTorch semantics exactly.
    module = ScalarPallas(init_value)
    result = module()
    jax.block_until_ready(result)
    assert result.shape == ()
    assert result.dtype == jnp.float32
    assert jnp.allclose(result, jnp.float32(init_value))

    # Exercise the standalone Pallas kernel once (explicit kernel-boundary
    # case).  The parameter buffer is not donated, so it can be reused.
    constant_1d = jnp.full((1,), init_value, dtype=jnp.float32)
    kernel_out = scalar_forward_kernel(constant_1d)
    jax.block_until_ready(kernel_out)
    assert kernel_out.shape == (1,)
    assert kernel_out.dtype == jnp.float32
    assert jnp.allclose(kernel_out[0], jnp.float32(init_value))
    assert jnp.allclose(kernel_out[0], result)

    # The non-donating kernel can be called again with the SAME buffer
    # (parameter-reuse pattern under jit) without error or a hidden copy.
    kernel_out2 = scalar_forward_kernel(constant_1d)
    jax.block_until_ready(kernel_out2)
    assert jnp.allclose(kernel_out2[0], result)

    print("KERNEL_OK")
</pallas_src>

<mosaic_0001>
module attributes {stable_mosaic.version = 11 : i64} {
  func.func @_scalar_kernel(%arg0: memref<1xf32, #tpu.memory_space<smem>>, %arg1: memref<1xf32, #tpu.memory_space<smem>>) attributes {dimension_semantics = [], scalar_prefetch = 0 : i64, scratch_operands = 0 : i64, tpu.core_type = #tpu.core_type<tc>} {
    %c0 = arith.constant 0 : index
    %0 = memref.load %arg0[%c0] : memref<1xf32, #tpu.memory_space<smem>>
    %c0_0 = arith.constant 0 : index
    %1 = memref.load %arg1[%c0_0] : memref<1xf32, #tpu.memory_space<smem>>
    memref.store %0, %arg1[%c0_0] : memref<1xf32, #tpu.memory_space<smem>>
    return
  }
}

</mosaic_0001>

<bundles_post_ra>
// kernel: tpu_custom_call.1
= control target key start
LH: loop header
LB: loop body
LE: loop exit
PB: predicated region body
PF: predicated region fallthrough
CT: control target
= control target key end

     0   :  { %7 = vsyncpa [#allocation4], 0  ;;  %s43_s11 = smov [#allocation3]   ;;  %s60_s0 = inlined_call_operand.<no memory space> [shape: f32[1], index: 0, kind: input, shape index: {}]   ;;  %s61_s1 = inlined_call_operand.hbm [shape: f32[1], index: 1, kind: output, shape index: {}]  }
   0x1   :  { %12 = sst [smem:[#allocation3]] %s60_s0  ;;  %s18_s10 = sshll.u32 %s61_s1, 4  ;;  %s19_s10 = int_to_ptr.hbm [resolvable:$true] %s18_s10 }
   0x2   :  { %21 = dma.smem_to_hbm %s43_s11, 16, %s19_s10, [#allocation4]  }
   0x3   :  { %41 = dma.done.wait [#allocation4], 16  }
   0x4   :  { %42 = vsyncadd [#allocation4], 4294967280 }
   0x5   :  { %26 = sfence }
   0x6   :  { %27 = vsyncpa [#allocation4], 1 }

</bundles_post_ra>
